<compile_context>
chip_gen: v5e
topology: v5e:2x2
jax: 0.10.0
libtpu: 0.0.40
codegen_flags: <defaults>
</compile_context>

<pallas_src>
import jax
import jax.numpy as jnp
from jax.experimental import pallas as pl
from jax.experimental.pallas import tpu as pltpu


def _tiny_mlp_kernel(xT_ref, w1T_ref, b1_ref, w2T_ref, b2_ref, oT_ref):
    # Layer 1: (Hp, D)bf16 @ (D, tb)bf16 -> (Hp, tb) f32 accumulation on the MXU.
    h = jnp.dot(w1T_ref[...], xT_ref[...], preferred_element_type=jnp.float32)
    h = h + b1_ref[...]                              # b1: (Hp, 1) broadcasts over batch lanes
    # F.leaky_relu, default negative_slope = 0.01 (single vmax instead of cmp+select).
    h = jnp.maximum(h, jnp.float32(0.01) * h)
    # Layer 2: (O, Hp)bf16 @ (Hp, tb)bf16 -> (O, tb) f32 accumulation.
    o = jnp.dot(w2T_ref[...], h.astype(jnp.bfloat16),
                preferred_element_type=jnp.float32) + b2_ref[...]
    oT_ref[...] = o.astype(oT_ref.dtype)


def _round_up(v, m):
    return ((v + m - 1) // m) * m


def prepare_params(w1, b1, w2, b2):
    """One-time (hoisted) weight prep: transpose, pad hidden 50 -> 128, cast to bf16.

    Padded hidden rows of w1T and the padded entries of b1 are zero, so the padded
    hidden activations are exactly 0 through leaky_relu and hit zero columns of w2T:
    the math is unchanged. x and the output are never padded.
    """
    D, H = w1.shape
    O = w2.shape[1]
    Hp = _round_up(H, 128)
    w1T = jnp.zeros((Hp, D), jnp.bfloat16).at[:H, :].set(w1.T.astype(jnp.bfloat16))
    b1c = jnp.zeros((Hp, 1), jnp.float32).at[:H, 0].set(b1.astype(jnp.float32))
    w2T = jnp.zeros((O, Hp), jnp.bfloat16).at[:, :H].set(w2.T.astype(jnp.bfloat16))
    b2c = b2.astype(jnp.float32).reshape(O, 1)
    return w1T, b1c, w2T, b2c


def tiny_mean_y_forward(x, params, *, block_b=8192):
    """x: [B, dim_x]; params from prepare_params -> [B, 2] (f32)."""
    w1T, b1c, w2T, b2c = params
    B, D = x.shape
    Hp = w1T.shape[0]
    O = w2T.shape[0]

    # Feature-major, bf16 input: (D, B). The transpose/cast live in XLA outside the kernel.
    xT = x.astype(jnp.bfloat16).T

    # Batch tile: single full-batch block for small B (block dims == array dims are exempt
    # from the (8,128) rule); otherwise 8192-column tiles (multiple of 128) so Pallas
    # double-buffers xT/oT and overlaps DMA with compute while weights stay resident.
    # If B > block_b and B % block_b != 0, the final tile's out-of-range columns are
    # masked on write (correct, slightly wasted compute).
    tb = B if B <= block_b else block_b
    grid = (pl.cdiv(B, tb),)

    cost = pl.CostEstimate(
        flops=2 * B * (D * Hp + Hp * O),
        transcendentals=0,
        bytes_accessed=2 * B * D + 4 * B * O + 2 * (Hp * D + O * Hp) + 4 * (Hp + O),
    )

    oT = pl.pallas_call(
        _tiny_mlp_kernel,
        out_shape=jax.ShapeDtypeStruct((O, B), jnp.float32),
        grid=grid,
        in_specs=[
            pl.BlockSpec((D, tb), lambda i: (0, i)),   # xT: tiled over batch (lane axis)
            pl.BlockSpec((Hp, D), lambda i: (0, 0)),   # w1T: resident
            pl.BlockSpec((Hp, 1), lambda i: (0, 0)),   # b1:  resident
            pl.BlockSpec((O, Hp), lambda i: (0, 0)),   # w2T: resident
            pl.BlockSpec((O, 1), lambda i: (0, 0)),    # b2:  resident
        ],
        out_specs=pl.BlockSpec((O, tb), lambda i: (0, i)),  # lane-dense (2, tb) output
        compiler_params=pltpu.CompilerParams(
            dimension_semantics=("parallel",),
        ),
        cost_estimate=cost,
    )(xT, w1T, b1c, w2T, b2c)

    return oT.T  # (B, 2)


def init_params(key, dim_x, hidden=50, out=2):
    """Deterministic init mimicking nn.Linear's U(-1/sqrt(fan_in), 1/sqrt(fan_in))."""
    k1, k2, k3, k4 = jax.random.split(key, 4)
    bound1 = 1.0 / jnp.sqrt(dim_x)
    bound2 = 1.0 / jnp.sqrt(hidden)
    w1 = jax.random.uniform(k1, (dim_x, hidden), jnp.float32, -bound1, bound1)
    b1 = jax.random.uniform(k2, (hidden,), jnp.float32, -bound1, bound1)
    w2 = jax.random.uniform(k3, (hidden, out), jnp.float32, -bound2, bound2)
    b2 = jax.random.uniform(k4, (out,), jnp.float32, -bound2, bound2)
    return w1, b1, w2, b2


def _reference(x, w1, b1, w2, b2):
    h = x @ w1 + b1
    h = jnp.where(h > 0, h, 0.01 * h)
    return h @ w2 + b2


if __name__ == "__main__":
    dim_x = 8
    batch = 4

    key = jax.random.PRNGKey(0)
    kx, kp, kx2 = jax.random.split(key, 3)
    x = jax.random.normal(kx, (batch, dim_x), jnp.float32)
    w1, b1, w2, b2 = init_params(kp, dim_x)

    # Hoisted, one-time weight prep (transpose + pad + bf16 cast).
    params = prepare_params(w1, b1, w2, b2)

    # Small-batch path (single full-array block).
    out = tiny_mean_y_forward(x, params)
    out = jax.block_until_ready(out)
    ref = _reference(x, w1, b1, w2, b2)
    assert out.shape == (batch, 2), out.shape
    # bf16 matmul inputs (f32 accumulation) -> ~1e-2 relative tolerance.
    assert jnp.allclose(out, ref, atol=2e-2, rtol=2e-2), jnp.max(jnp.abs(out - ref))

    # Exercise the tiled grid path (non-divisible batch, masked remainder tile).
    x2 = jax.random.normal(kx2, (300, dim_x), jnp.float32)
    out2 = jax.block_until_ready(tiny_mean_y_forward(x2, params, block_b=128))
    ref2 = _reference(x2, w1, b1, w2, b2)
    assert out2.shape == (300, 2), out2.shape
    assert jnp.allclose(out2, ref2, atol=2e-2, rtol=2e-2), jnp.max(jnp.abs(out2 - ref2))

    print("KERNEL_OK")
</pallas_src>

<mosaic_0001>
module attributes {stable_mosaic.version = 11 : i64} {
  func.func @_tiny_mlp_kernel(%arg0: i32, %arg1: memref<8x4xbf16, #tpu.memory_space<vmem>>, %arg2: memref<128x8xbf16, #tpu.memory_space<vmem>>, %arg3: memref<128x1xf32, #tpu.memory_space<vmem>>, %arg4: memref<2x128xbf16, #tpu.memory_space<vmem>>, %arg5: memref<2x1xf32, #tpu.memory_space<vmem>>, %arg6: memref<2x4xf32, #tpu.memory_space<vmem>>) attributes {dimension_semantics = [#tpu.dimension_semantics<parallel>], iteration_bounds = array<i64: 1>, scalar_prefetch = 0 : i64, scratch_operands = 0 : i64, tpu.core_type = #tpu.core_type<tc>, window_params = [{transform_indices = @transform_0, window_bounds = array<i64: 8, 4>}, {pipeline_mode = #tpu.pipeline_mode<synchronous>, transform_indices = @transform_1, window_bounds = array<i64: 128, 8>}, {pipeline_mode = #tpu.pipeline_mode<synchronous>, transform_indices = @transform_2, window_bounds = array<i64: 128, 1>}, {pipeline_mode = #tpu.pipeline_mode<synchronous>, transform_indices = @transform_3, window_bounds = array<i64: 2, 128>}, {pipeline_mode = #tpu.pipeline_mode<synchronous>, transform_indices = @transform_4, window_bounds = array<i64: 2, 1>}, {transform_indices = @transform_5, window_bounds = array<i64: 2, 4>}]} {
    %c0 = arith.constant 0 : index
    %c0_0 = arith.constant 0 : index
    %0 = vector.load %arg2[%c0, %c0_0] : memref<128x8xbf16, #tpu.memory_space<vmem>>, vector<128x8xbf16>
    %c0_1 = arith.constant 0 : index
    %c0_2 = arith.constant 0 : index
    %1 = vector.load %arg1[%c0_1, %c0_2] : memref<8x4xbf16, #tpu.memory_space<vmem>>, vector<8x4xbf16>
    %cst = arith.constant dense<0.000000e+00> : vector<128x4xf32>
    %2 = tpu.matmul %0, %1, %cst {dimension_numbers = #tpu.dot_dimension_numbers<[1], [0], [0], [1], [0, 0, 1, 1], [], []>} : vector<128x8xbf16>, vector<8x4xbf16>, vector<128x4xf32> -> vector<128x4xf32>
    %c0_3 = arith.constant 0 : index
    %c0_4 = arith.constant 0 : index
    %3 = vector.load %arg3[%c0_3, %c0_4] : memref<128x1xf32, #tpu.memory_space<vmem>>, vector<128x1xf32>
    %4 = vector.broadcast %3 : vector<128x1xf32> to vector<128x4xf32>
    %5 = arith.addf %2, %4 : vector<128x4xf32>
    %cst_5 = arith.constant 0.00999999977 : f32
    %6 = vector.broadcast %cst_5 : f32 to vector<128x4xf32>
    %7 = arith.mulf %6, %5 : vector<128x4xf32>
    %8 = arith.maximumf %5, %7 : vector<128x4xf32>
    %c0_6 = arith.constant 0 : index
    %c0_7 = arith.constant 0 : index
    %9 = vector.load %arg4[%c0_6, %c0_7] : memref<2x128xbf16, #tpu.memory_space<vmem>>, vector<2x128xbf16>
    %10 = arith.truncf %8 : vector<128x4xf32> to vector<128x4xbf16>
    %cst_8 = arith.constant dense<0.000000e+00> : vector<2x4xf32>
    %11 = tpu.matmul %9, %10, %cst_8 {dimension_numbers = #tpu.dot_dimension_numbers<[1], [0], [0], [1], [0, 0, 1, 1], [], []>} : vector<2x128xbf16>, vector<128x4xbf16>, vector<2x4xf32> -> vector<2x4xf32>
    %c0_9 = arith.constant 0 : index
    %c0_10 = arith.constant 0 : index
    %12 = vector.load %arg5[%c0_9, %c0_10] : memref<2x1xf32, #tpu.memory_space<vmem>>, vector<2x1xf32>
    %13 = vector.broadcast %12 : vector<2x1xf32> to vector<2x4xf32>
    %14 = arith.addf %11, %13 : vector<2x4xf32>
    %c0_11 = arith.constant 0 : index
    %c0_12 = arith.constant 0 : index
    %15 = vector.load %arg6[%c0_11, %c0_12] : memref<2x4xf32, #tpu.memory_space<vmem>>, vector<2x4xf32>
    tpu.vector_store %arg6[%c0_11, %c0_12], %14 {strides = array<i32>} : memref<2x4xf32, #tpu.memory_space<vmem>>, vector<2x4xf32>,
    return
  }
  func.func @transform_0(%arg0: i32) -> (i32, i32) {
    %c0_i32 = arith.constant 0 : i32
    %c0_i32_0 = arith.constant 0 : i32
    return %c0_i32, %arg0 : i32, i32
  }
  func.func @transform_1(%arg0: i32) -> (i32, i32) {
    %c0_i32 = arith.constant 0 : i32
    %c0_i32_0 = arith.constant 0 : i32
    %c0_i32_1 = arith.constant 0 : i32
    return %c0_i32, %c0_i32_0 : i32, i32
  }
  func.func @transform_2(%arg0: i32) -> (i32, i32) {
    %c0_i32 = arith.constant 0 : i32
    %c0_i32_0 = arith.constant 0 : i32
    %c0_i32_1 = arith.constant 0 : i32
    return %c0_i32, %c0_i32_0 : i32, i32
  }
  func.func @transform_3(%arg0: i32) -> (i32, i32) {
    %c0_i32 = arith.constant 0 : i32
    %c0_i32_0 = arith.constant 0 : i32
    %c0_i32_1 = arith.constant 0 : i32
    return %c0_i32, %c0_i32_0 : i32, i32
  }
  func.func @transform_4(%arg0: i32) -> (i32, i32) {
    %c0_i32 = arith.constant 0 : i32
    %c0_i32_0 = arith.constant 0 : i32
    %c0_i32_1 = arith.constant 0 : i32
    return %c0_i32, %c0_i32_0 : i32, i32
  }
  func.func @transform_5(%arg0: i32) -> (i32, i32) {
    %c0_i32 = arith.constant 0 : i32
    %c0_i32_0 = arith.constant 0 : i32
    return %c0_i32, %arg0 : i32, i32
  }
}

</mosaic_0001>

<bundles_post_ra>
// kernel: tpu_custom_call.1
= control target key start
LH: loop header
LB: loop body
LE: loop exit
PB: predicated region body
PF: predicated region fallthrough
CT: control target
= control target key end

     0   :  { %vm200_vm0 = vcmask 1043456   ;;  %v412_v2 = vmov 0   ;;  %vm175_vm1 = vcmask 64512   ;;  %s542_s0 = inlined_call_operand.vmem [shape: bf16[8,4], index: 0, kind: input, shape index: {}]   ;;  %s543_s1 = inlined_call_operand.vmem [shape: bf16[128,8], index: 1, kind: input, shape index: {}]   ;;  %s544_s2 = inlined_call_operand.vmem [shape: f32[128,1], index: 2, kind: input, shape index: {}]   ;;  %s545_s3 = inlined_call_operand.vmem [shape: bf16[2,128], index: 3, kind: input, shape index: {}]   ;;  %s546_s4 = inlined_call_operand.vmem [shape: f32[2,1], index: 4, kind: input, shape index: {}]   ;;  %s547_s5 = inlined_call_operand.hbm [shape: f32[2,4], index: 5, kind: output, shape index: {}]  }
   0x1   :  { %v53_v0 = vld [vmem:[%s544_s2 + $0x70] sm:$0xff]  ;;  %v38_v1 = vld [vmem:[%s542_s0] sm:$0xf]  ;;  %383 = vset.pattern.permute.xlu0 %v412_v2  ;;  %384 = vset.pattern.permute.xlu1 %v412_v2  ;;  %v374_v6 = vld [vmem:[%s543_s1 + $0x18] sm:$0xff] }
   0x2   :  { %v202_v3 = vsel %vm200_vm0, %v38_v1, 0  ;;  %v371_v4 = vld [vmem:[%s543_s1] sm:$0xff]  ;;  %127 = vperm.xlu0 %383, %v53_v0   ;;  %v377_v7 = vld [vmem:[%s543_s1 + $0x30] sm:$0xff]  ;;  %385 = vset.pattern.permute.xlu2 %v412_v2  ;;  %v54_v9 = vld [vmem:[%s544_s2 + $0x78] sm:$0xff] }
   0x3   :  { %v51_v5 = vld [vmem:[%s544_s2 + $0x60] sm:$0xff]  ;;  %211 = vmatpush.bf16.msra.mxu0 %v202_v3  ;;  %379 = vmatpush.bf16.msra.mxu2 %v202_v3  ;;  %v49_v8 = vld [vmem:[%s544_s2 + $0x50] sm:$0xff] }
   0x4   :  { %380 = vmatpush.bf16.msra.mxu3 %v202_v3  ;;  %117 = vperm.xlu1 %384, %v51_v5  }
   0x5   :  { %107 = vperm.xlu2 %385, %v49_v8  }
   0x6   :  { %363 = vmatmul.msk.bf16.vlgmr.msra.gmra.mxu0 %vm175_vm1, %v371_v4  ;;  %366 = vmatmul.msk.bf16.vlgmr.msra.gmra.mxu2 %vm175_vm1, %v374_v6 }
   0x7   :  { %369 = vmatmul.msk.bf16.vlgmr.msra.gmra.mxu3 %vm175_vm1, %v377_v7 }
   0x8   :  { %10 = vsyncpa [#allocation3], 0  ;;  %v52_v10 = vld [vmem:[%s544_s2 + $0x68] sm:$0xff]  ;;  %v50_v11 = vld [vmem:[%s544_s2 + $0x58] sm:$0xff]  ;;  %s322_s21 = sshll.u32 %s547_s5, 4  ;;  %vm313_vm2 = vcmask 25600   ;;  %s323_s21 = int_to_ptr.hbm [resolvable:$true] %s322_s21 }
   0x9   :  { %v47_v12 = vld [vmem:[%s544_s2 + $0x40] sm:$0xff]  ;;  %v372_v13 = vld [vmem:[%s543_s1 + $0x8] sm:$0xff]  ;;  %v378_v16 = vld [vmem:[%s543_s1 + $0x38] sm:$0xff] }
   0xa   :  { %132 = vperm.xlu0 %383, %v54_v9   ;;  %v48_v14 = vld [vmem:[%s544_s2 + $0x48] sm:$0xff]  ;;  %v375_v15 = vld [vmem:[%s543_s1 + $0x20] sm:$0xff]  ;;  %v45_v17 = vld [vmem:[%s544_s2 + $0x30] sm:$0xff] }
   0xb   :  { %v46_v18 = vld [vmem:[%s544_s2 + $0x38] sm:$0xff]  ;;  %v43_v19 = vld [vmem:[%s544_s2 + $0x20] sm:$0xff]  ;;  %v44_v20 = vld [vmem:[%s544_s2 + $0x28] sm:$0xff] }
   0xc   :  { %122 = vperm.xlu1 %384, %v52_v10   ;;  %v41_v21 = vld [vmem:[%s544_s2 + $0x10] sm:$0xff]  ;;  %v42_v23 = vld [vmem:[%s544_s2 + $0x18] sm:$0xff]  ;;  %v376_v24 = vld [vmem:[%s543_s1 + $0x28] sm:$0xff] }
   0xd   :  { %112 = vperm.xlu2 %385, %v50_v11   ;;  %v373_v22 = vld [vmem:[%s543_s1 + $0x10] sm:$0xff]  ;;  %v39_v25 = vld [vmem:[%s544_s2] sm:$0xff]  ;;  %v40_v26 = vld [vmem:[%s544_s2 + $0x8] sm:$0xff] }
   0xe   :  { %v294_v27 = vld [vmem:[%s546_s4] sm:$0x3]  ;;  %s413_s4 = smov [#allocation2]  }
   0xf   :  { %s320_s18 = sshll.u32 %s413_s4, 4  ;;  %s321_s18 = int_to_ptr.vmem [resolvable:$true] %s320_s18 }
  0x12   :  { %97 = vperm.xlu0 %383, %v47_v12  }
  0x14   :  { %102 = vperm.xlu1 %384, %v48_v14  }
  0x15   :  { %87 = vperm.xlu2 %385, %v45_v17  }
  0x16   :  { %364 = vmatmul.msk.bf16.gmra.mxu0 %vm175_vm1, %v372_v13  ;;  %367 = vmatmul.msk.bf16.gmra.mxu2 %vm175_vm1, %v375_v15 }
  0x17   :  { %370 = vmatmul.msk.bf16.gmra.mxu3 %vm175_vm1, %v378_v16 }
  0x1a   :  { %92 = vperm.xlu0 %383, %v46_v18  }
  0x1c   :  { %77 = vperm.xlu1 %384, %v43_v19  }
  0x1d   :  { %82 = vperm.xlu2 %385, %v44_v20  }
  0x22   :  { %67 = vperm.xlu0 %383, %v41_v21  }
  0x24   :  { %72 = vperm.xlu1 %384, %v42_v23  }
  0x25   :  { %57 = vperm.xlu2 %385, %v39_v25  }
  0x26   :  { %365 = vmatmul.msk.bf16.gmra.mxu0 %vm175_vm1, %v373_v22  ;;  %368 = vmatmul.msk.bf16.gmra.mxu2 %vm175_vm1, %v376_v24 }
  0x2a   :  { %62 = vperm.xlu0 %383, %v40_v26  }
  0x2c   :  { %297 = vperm.xlu1 %384, %v294_v27  }
  0x5f   :  { %v108_v37 = vpop.permute.xlu2 %107 }
  0x67   :  { %v113_v44 = vpop.permute.xlu2 %112 }
  0x6f   :  { %v88_v63 = vpop.permute.xlu2 %87 }
  0x74   :  { %v128_v31 = vpop.permute.xlu0 %127 }
  0x76   :  { %v118_v35 = vpop.permute.xlu1 %117 }
  0x77   :  { %v83_v13 = vpop.permute.xlu2 %82 }
  0x7c   :  { %v133_v36 = vpop.permute.xlu0 %132 }
  0x7e   :  { %v123_v41 = vpop.permute.xlu1 %122 }
  0x83   :  { %v530_v28 = vpop.f32.mrf.mxu0 }
  0x84   :  { %v98_v43 = vpop.permute.xlu0 %97 }
  0x86   :  { %v103_v57 = vpop.permute.xlu1 %102 }
  0x89   :  { %v228_v29 = vpop.f32.mrf.mxu2 }
  0x8a   :  { %v243_v30 = vpop.f32.mrf.mxu3  ;;  %v229_v15 = vadd.f32 %v228_v29, %v88_v63 }
  0x8b   :  { %v532_v32 = vpop.f32.mrf.mxu0  ;;  %v244_v49 = vadd.f32 %v243_v30, %v118_v35 }
  0x8c   :  { %v93_v60 = vpop.permute.xlu0 %92  ;;  %v259_v23 = vmul.f32 0.01, %v229_v15 }
  0x8d   :  { %v265_v54 = vmul.f32 0.01, %v244_v49 }
  0x8e   :  { %v78_v4 = vpop.permute.xlu1 %77 }
  0x8f   :  { %v281_v62 = vmax.f32 %v244_v49, %v265_v54 }
  0x91   :  { %v230_v33 = vpop.f32.mrf.mxu2 }
  0x92   :  { %v245_v34 = vpop.f32.mrf.mxu3  ;;  %v231_v10 = vadd.f32 %v230_v33, %v93_v60 }
  0x93   :  { %v218_v38 = vpop.f32.mrf.mxu0  ;;  %v246_v45 = vadd.f32 %v245_v34, %v123_v41 }
  0x94   :  { %v68_v9 = vpop.permute.xlu0 %67  ;;  %v260_v19 = vmul.f32 0.01, %v231_v10 }
  0x95   :  { %v266_v52 = vmul.f32 0.01, %v246_v45  ;;  %v219_v26 = vadd.f32 %v218_v38, %v68_v9 }
  0x96   :  { %v73_v27 = vpop.permute.xlu1 %72  ;;  %v276_v30 = vmax.f32 %v231_v10, %v260_v19 }
  0x97   :  { %v282_v58 = vmax.f32 %v246_v45, %v266_v52 }
  0x99   :  { %v233_v39 = vpop.f32.mrf.mxu2  ;;  %v292_v1 = vpack.c.bf16 %v282_v58, %v281_v62 }
  0x9a   :  { %v248_v40 = vpop.f32.mrf.mxu3  ;;  %v234_v6 = vadd.f32 %v233_v39, %v98_v43  ;;  %v255_v39 = vmul.f32 0.01, %v219_v26 }
  0x9b   :  { %v249_v42 = vadd.f32 %v248_v40, %v128_v31  ;;  %v220_v46 = vpop.f32.mrf.mxu0 }
  0x9c   :  { %v261_v16 = vmul.f32 0.01, %v234_v6  ;;  %v221_v31 = vadd.f32 %v220_v46, %v73_v27  ;;  %v63_v35 = vpop.permute.xlu0 %62  ;;  %v271_v38 = vmax.f32 %v219_v26, %v255_v39 }
  0x9d   :  { %v267_v50 = vmul.f32 0.01, %v249_v42  ;;  %v216_v41 = vadd.f32 %v532_v32, %v63_v35  ;;  %v285_v32 = vld [vmem:[%s545_s3] sm:$0x1] }
  0x9e   :  { %v277_v24 = vmax.f32 %v234_v6, %v261_v16  ;;  %v256_v40 = vmul.f32 0.01, %v221_v31 }
  0x9f   :  { %v283_v55 = vmax.f32 %v249_v42, %v267_v50  ;;  %v254_v46 = vmul.f32 0.01, %v216_v41 }
  0xa1   :  { %v235_v47 = vpop.f32.mrf.mxu2  ;;  %v270_v50 = vmax.f32 %v216_v41, %v254_v46 }
  0xa2   :  { %v250_v48 = vpop.f32.mrf.mxu3  ;;  %v236_v3 = vadd.f32 %v235_v47, %v103_v57  ;;  %v272_v47 = vmax.f32 %v221_v31, %v256_v40 }
  0xa3   :  { %v251_v51 = vadd.f32 %v250_v48, %v133_v36  ;;  %v223_v0 = vpop.f32.mrf.mxu0  ;;  %v275_v36 = vmax.f32 %v229_v15, %v259_v23 }
  0xa4   :  { %v262_v11 = vmul.f32 0.01, %v236_v3  ;;  %v224_v25 = vadd.f32 %v223_v0, %v78_v4 }
  0xa5   :  { %v268_v53 = vmul.f32 0.01, %v251_v51  ;;  %v289_v43 = vpack.c.bf16 %v276_v30, %v275_v36 }
  0xa6   :  { %v278_v20 = vmax.f32 %v236_v3, %v262_v11  ;;  %v257_v29 = vmul.f32 0.01, %v224_v25 }
  0xa7   :  { %v284_v56 = vmax.f32 %v251_v51, %v268_v53  ;;  %v287_v51 = vpack.c.bf16 %v272_v47, %v271_v38 }
  0xa8   :  { %v290_v34 = vpack.c.bf16 %v278_v20, %v277_v24  ;;  %v273_v45 = vmax.f32 %v224_v25, %v257_v29 }
  0xa9   :  { %v293_v59 = vpack.c.bf16 %v284_v56, %v283_v55  ;;  %v238_v61 = vpop.f32.mrf.mxu2 }
  0xaa   :  { %v239_v2 = vadd.f32 %v238_v61, %v108_v37  ;;  %v58_v37 = vpop.permute.xlu2 %57 }
  0xab   :  { %300 = vmatpush.bf16.msra.mxu1 %v293_v59  ;;  %v225_v14 = vpop.f32.mrf.mxu0 }
  0xac   :  { %v263_v7 = vmul.f32 0.01, %v239_v2  ;;  %v226_v21 = vadd.f32 %v225_v14, %v83_v13 }
  0xae   :  { %v279_v17 = vmax.f32 %v239_v2, %v263_v7  ;;  %v258_v33 = vmul.f32 0.01, %v226_v21 }
  0xaf   :  { %301 = vmatpush.bf16.msra.mxu1 %v292_v1 }
  0xb0   :  { %v274_v42 = vmax.f32 %v226_v21, %v258_v33 }
  0xb1   :  { %v240_v5 = vpop.f32.mrf.mxu2 }
  0xb2   :  { %v241_v8 = vadd.f32 %v240_v5, %v113_v44  ;;  %v214_v44 = vadd.f32 %v530_v28, %v58_v37  ;;  %v288_v48 = vpack.c.bf16 %v274_v42, %v273_v45  ;;  %v298_v28 = vpop.permute.xlu1 %297 }
  0xb4   :  { %v264_v12 = vmul.f32 0.01, %v241_v8  ;;  %v253_v49 = vmul.f32 0.01, %v214_v44 }
  0xb6   :  { %v280_v18 = vmax.f32 %v241_v8, %v264_v12  ;;  %v269_v52 = vmax.f32 %v214_v44, %v253_v49 }
  0xb8   :  { %v291_v22 = vpack.c.bf16 %v280_v18, %v279_v17  ;;  %v286_v53 = vpack.c.bf16 %v270_v50, %v269_v52 }
  0xba   :  { %302 = vmatpush.bf16.msra.mxu1 %v291_v22 }
  0xbe   :  { %303 = vmatpush.bf16.msra.mxu1 %v290_v34 }
  0xc2   :  { %304 = vmatpush.bf16.msra.mxu1 %v289_v43 }
  0xc6   :  { %305 = vmatpush.bf16.msra.mxu1 %v288_v48 }
  0xca   :  { %306 = vmatpush.bf16.msra.mxu1 %v287_v51 }
  0xce   :  { %307 = vmatpush.bf16.msra.mxu1 %v286_v53 }
  0xd1   :  { %308 = vmatmul.bf16.vlgmr.msra.gmra.mxu1 %v285_v32 }
 0x14e   :  { %v309_v54 = vpop.f32.mrf.mxu1 }
 0x14f   :  { %v310_v55 = vadd.f32 %v309_v54, %v298_v28 }
 0x151   :  { %314 = vst.msk [vmem:[#allocation2] sm:$0x3] %vm313_vm2, %v310_v55 }
 0x152   :  { %325 = dma.vmem_to_hbm [thread:$0]  %s321_s18, 32, %s323_s21, [#allocation3]  }
 0x156   :  { %v311_v56 = vpop.f32.mrf.mxu1 }
 0x157   :  { %410 = dma.done.wait [#allocation3], 32  }
 0x158   :  { %411 = vsyncadd [#allocation3], 4294967264 }
 0x159   :  { %330 = vsyncpa [#allocation3], 1 }

</bundles_post_ra>
